<compile_context>
chip_gen: v7x
topology: tpu7x:2x2x1
jax: 0.10.0
libtpu: 0.0.40
codegen_flags: <defaults>
</compile_context>

<pallas_src>
import jax
import jax.numpy as jnp
from jax.experimental import pallas as pl
from jax.experimental.pallas import tpu as pltpu

# ----- module hyper-parameters (small, consistent with the deepseek block) -----
B = 2        # batch
S = 8        # sequence length
D1 = 32      # input dim  (d_model)
D2 = 64      # hidden dim (d_ffn)
D3 = 32      # output dim

_HI = jax.lax.Precision.HIGHEST


def mlp_kernel(x_ref, w12_ref, w3_ref, o_ref):
    """x_ref:  (N, D1+1)     -- token activations with a trailing ones column
    w12_ref:   (D1+1, 2*D2)  -- [w1.T || w2.T] with [b1 || b2] as the last row
    w3_ref:    (D2+1, D3)    -- w3.T with b3 as the last row
    o_ref:     (N, D3)
    """
    # Fused up-projection: one lane-dense (N, 128) MXU matmul; the ones column
    # of x against the bias row of w12 performs the bias add inside the matmul.
    t = jnp.dot(x_ref[...], w12_ref[...],
                preferred_element_type=jnp.float32, precision=_HI)
    h1 = t[:, :D2]                                   # w1(x) + b1
    h2 = t[:, D2:]                                   # w2(x) + b2
    hid = h1 * jax.nn.sigmoid(h1) * h2               # SiLU(w1 x) * w2 x

    # Down-projection; bias travels in the same operand (last row of w3_ref),
    # added with a single broadcast VPU op instead of a separate DMA.
    out = jnp.dot(hid, w3_ref[:D2, :],
                  preferred_element_type=jnp.float32, precision=_HI)
    out = out + w3_ref[D2:D2 + 1, :]
    o_ref[...] = out.astype(o_ref.dtype)


def mlp_forward(x, params):
    """x: (B, S, D1) float32 -> (B, S, D3) float32."""
    Bn, Sn, _ = x.shape
    n = Bn * Sn
    x2d = x.reshape(n, D1)
    # Append the constant ones column host-side (cheap XLA concat outside the
    # kernel) so the first-matmul bias is fused into the weight DMA.
    x_aug = jnp.concatenate([x2d, jnp.ones((n, 1), x2d.dtype)], axis=1)

    operands = (x_aug, params["w12_aug"], params["w3_aug"])
    vmem_spec = lambda: pl.BlockSpec(memory_space=pltpu.MemorySpace.VMEM)

    out2d = pl.pallas_call(
        mlp_kernel,
        out_shape=jax.ShapeDtypeStruct((n, D3), jnp.float32),
        in_specs=[vmem_spec() for _ in operands],
        out_specs=vmem_spec(),
    )(*operands)
    return out2d.reshape(Bn, Sn, D3)


def make_params(key):
    """Deterministic synthetic parameters with nn.Linear shapes, pre-fused."""
    ks = jax.random.split(key, 6)
    sc = 0.05
    w1 = sc * jax.random.normal(ks[0], (D2, D1), jnp.float32)   # nn.Linear(d1, d2).weight
    b1 = sc * jax.random.normal(ks[1], (D2,), jnp.float32)
    w2 = sc * jax.random.normal(ks[2], (D2, D1), jnp.float32)
    b2 = sc * jax.random.normal(ks[3], (D2,), jnp.float32)
    w3 = sc * jax.random.normal(ks[4], (D3, D2), jnp.float32)   # nn.Linear(d2, d3).weight
    b3 = sc * jax.random.normal(ks[5], (D3,), jnp.float32)

    # Kernel params:
    #   w12_aug = [[w1.T || w2.T],      shape (D1+1, 2*D2) = (33, 128)
    #              [b1   || b2  ]]
    #   w3_aug  = [[w3.T],              shape (D2+1, D3)   = (65, 32)
    #              [b3  ]]
    w12_t = jnp.concatenate([w1.T, w2.T], axis=1)                       # (D1, 2*D2)
    b12 = jnp.concatenate([b1, b2]).reshape(1, 2 * D2)                  # (1, 2*D2)
    w12_aug = jnp.concatenate([w12_t, b12], axis=0)                     # (D1+1, 2*D2)
    w3_aug = jnp.concatenate([w3.T, b3.reshape(1, D3)], axis=0)         # (D2+1, D3)

    return {
        # raw Linear params (for the pure-JAX reference)
        "w1": w1, "b1": b1, "w2": w2, "b2": b2, "w3": w3, "b3": b3,
        # fused kernel operands (3 total DMAs incl. x)
        "w12_aug": w12_aug,
        "w3_aug": w3_aug,
    }


def reference_forward(x, p):
    """Pure-JAX replica of the PyTorch MLP forward (fp32, HIGHEST precision)."""
    h1 = jnp.dot(x, p["w1"].T, precision=_HI) + p["b1"]
    h2 = jnp.dot(x, p["w2"].T, precision=_HI) + p["b2"]
    return jnp.dot(jax.nn.silu(h1) * h2, p["w3"].T, precision=_HI) + p["b3"]


if __name__ == "__main__":
    key = jax.random.PRNGKey(0)
    kx, kp = jax.random.split(key)
    x = jax.random.normal(kx, (B, S, D1), jnp.float32)
    params = make_params(kp)

    out = mlp_forward(x, params)
    out = jax.block_until_ready(out)

    ref = reference_forward(x, params)
    assert out.shape == (B, S, D3)
    assert jnp.allclose(out, ref, atol=1e-5, rtol=1e-4), "mismatch vs reference"
    print("KERNEL_OK")
</pallas_src>

<mosaic_0001>
module attributes {stable_mosaic.version = 11 : i64} {
  func.func @mlp_kernel(%arg0: memref<16x33xf32, #tpu.memory_space<vmem>>, %arg1: memref<33x128xf32, #tpu.memory_space<vmem>>, %arg2: memref<65x32xf32, #tpu.memory_space<vmem>>, %arg3: memref<16x32xf32, #tpu.memory_space<vmem>>) attributes {dimension_semantics = [], scalar_prefetch = 0 : i64, scratch_operands = 0 : i64, tpu.core_type = #tpu.core_type<tc>} {
    %c0 = arith.constant 0 : index
    %c0_0 = arith.constant 0 : index
    %0 = vector.load %arg0[%c0, %c0_0] : memref<16x33xf32, #tpu.memory_space<vmem>>, vector<16x33xf32>
    %c0_1 = arith.constant 0 : index
    %c0_2 = arith.constant 0 : index
    %1 = vector.load %arg1[%c0_1, %c0_2] : memref<33x128xf32, #tpu.memory_space<vmem>>, vector<33x128xf32>
    %cst = arith.constant dense<0.000000e+00> : vector<16x128xf32>
    %2 = tpu.matmul %0, %1, %cst {dimension_numbers = #tpu.dot_dimension_numbers<[1], [0], [0], [1], [0, 0, 1, 1], [], []>, precision = #tpu.contract_precision<fp32>} : vector<16x33xf32>, vector<33x128xf32>, vector<16x128xf32> -> vector<16x128xf32>
    %3 = vector.extract_strided_slice %2 {offsets = [0, 0], sizes = [16, 64], strides = [1, 1]} : vector<16x128xf32> to vector<16x64xf32>
    %4 = vector.extract_strided_slice %2 {offsets = [0, 64], sizes = [16, 64], strides = [1, 1]} : vector<16x128xf32> to vector<16x64xf32>
    %5 = arith.negf %3 : vector<16x64xf32>
    %6 = math.exp %5 : vector<16x64xf32>
    %cst_3 = arith.constant 1.000000e+00 : f32
    %7 = vector.broadcast %cst_3 : f32 to vector<16x64xf32>
    %8 = arith.addf %7, %6 : vector<16x64xf32>
    %9 = arith.divf %7, %8 : vector<16x64xf32>
    %10 = arith.mulf %3, %9 : vector<16x64xf32>
    %11 = arith.mulf %10, %4 : vector<16x64xf32>
    %c0_4 = arith.constant 0 : index
    %c0_5 = arith.constant 0 : index
    %12 = vector.load %arg2[%c0_4, %c0_5] : memref<65x32xf32, #tpu.memory_space<vmem>>, vector<64x32xf32>
    %cst_6 = arith.constant dense<0.000000e+00> : vector<16x32xf32>
    %13 = tpu.matmul %11, %12, %cst_6 {dimension_numbers = #tpu.dot_dimension_numbers<[1], [0], [0], [1], [0, 0, 1, 1], [], []>, precision = #tpu.contract_precision<fp32>} : vector<16x64xf32>, vector<64x32xf32>, vector<16x32xf32> -> vector<16x32xf32>
    %c64 = arith.constant 64 : index
    %c0_7 = arith.constant 0 : index
    %14 = vector.load %arg2[%c64, %c0_7] : memref<65x32xf32, #tpu.memory_space<vmem>>, vector<1x32xf32>
    %15 = vector.broadcast %14 : vector<1x32xf32> to vector<16x32xf32>
    %16 = arith.addf %13, %15 : vector<16x32xf32>
    %c0_8 = arith.constant 0 : index
    %c0_9 = arith.constant 0 : index
    %17 = vector.load %arg3[%c0_8, %c0_9] : memref<16x32xf32, #tpu.memory_space<vmem>>, vector<16x32xf32>
    tpu.vector_store %arg3[%c0_8, %c0_9], %16 {strides = array<i32>} : memref<16x32xf32, #tpu.memory_space<vmem>>, vector<16x32xf32>,
    return
  }
}

</mosaic_0001>

<bundles_post_ra>
// kernel: tpu_custom_call.1
= control target key start
LH: loop header
LB: loop body
LE: loop exit
PB: predicated region body
PF: predicated region fallthrough
CT: control target
= control target key end

     0   :  { %vm29_vm0 = vcmask 1040384   ;;  %vm22_vm1 = vcmask 269312   ;;  %s1918_s0 = inlined_call_operand.vmem [shape: f32[16,33], index: 0, kind: input, shape index: {}]   ;;  %s1919_s1 = inlined_call_operand.vmem [shape: f32[33,128], index: 1, kind: input, shape index: {}]   ;;  %s1920_s2 = inlined_call_operand.vmem [shape: f32[65,32], index: 2, kind: input, shape index: {}]   ;;  %s1921_s3 = inlined_call_operand.hbm [shape: f32[16,32], index: 3, kind: output, shape index: {}]  }
   0x1   :  { %v17_v0 = vld [vmem:[%s1919_s1] sm:$0xff]  ;;  %v18_v1 = vld [vmem:[%s1919_s1 + $0x8] sm:$0xff]  ;;  %v19_v2 = vld [vmem:[%s1919_s1 + $0x10] sm:$0xff] }
   0x2   :  { %v34_v3 = vand.u32 4294901760, %v17_v0  ;;  %v37_v4 = vand.u32 4294901760, %v18_v1  ;;  %v20_v5 = vld [vmem:[%s1919_s1 + $0x18] sm:$0xff]  ;;  %v40_v6 = vand.u32 4294901760, %v19_v2  ;;  %v21_v7 = vld [vmem:[%s1919_s1 + $0x20] sm:$0x1] }
   0x3   :  { %v43_v8 = vand.u32 4294901760, %v20_v5  ;;  %v31_v9 = vsel %vm29_vm0, %v21_v7, 0  ;;  %v15_v10 = vld [vmem:[%s1918_s0] sm:$0xff]  ;;  %v16_v11 = vld [vmem:[%s1918_s0 + $0x8] sm:$0xff] }
   0x4   :  { %8 = vsyncpa [#allocation3], 0  ;;  %v1761_v12 = vpack.c.bf16 %v37_v4, %v34_v3  ;;  %v1763_v13 = vand.u32 4294901760, %v31_v9  ;;  %v24_v14 = vsel %vm22_vm1, %v15_v10, 0  ;;  %v27_v15 = vsel %vm22_vm1, %v16_v11, 0  ;;  %v598_v53 = vld [vmem:[%s1920_s2] sm:$0xff] }
   0x5   :  { %v1765_v16 = vpack.c.bf16 %v43_v8, %v40_v6  ;;  %v1767_v17 = vand.u32 4294901760, %v24_v14  ;;  %v1769_v18 = vand.u32 4294901760, %v27_v15  ;;  %v1771_v19 = vsub.f32 %v17_v0, %v34_v3  ;;  %v599_v54 = vld [vmem:[%s1920_s2 + $0x8] sm:$0xff]  ;;  %v600_v55 = vld [vmem:[%s1920_s2 + $0x10] sm:$0xff]  ;;  %v601_v58 = vld [vmem:[%s1920_s2 + $0x18] sm:$0xff]  ;;  %s1716_s13 = smov 64  }
   0x6   :  { %1515 = vmatprep.subr.bf16.mxu0 %v1761_v12  ;;  %v132_v20 = vsub.f32 %v18_v1, %v37_v4  ;;  %v139_v21 = vsub.f32 %v19_v2, %v40_v6  ;;  %v146_v22 = vsub.f32 %v20_v5, %v43_v8  ;;  %v153_v23 = vsub.f32 %v31_v9, %v1763_v13  ;;  %s1717_s16 = smov [#allocation2]  }
   0x7   :  { %1517 = vmatpush3.bf16.msra.mxu0 %v1761_v12  ;;  %v104_v24 = vsub.f32 %v24_v14, %v1767_v17  ;;  %v126_v25 = vand.u32 4294901760, %v1771_v19  ;;  %v114_v26 = vsub.f32 %v27_v15, %v1769_v18  ;;  %v619_v56 = vand.u32 4294901760, %v598_v53  ;;  %s1206_s17 = sshll.u32 %s1717_s16, 4  ;;  %s1207_s17 = int_to_ptr.vmem [resolvable:$true] %s1206_s17 }
   0x8   :  { %1519 = vmatprep.subr.bf16.mxu0 %v1765_v16  ;;  %v133_v27 = vand.u32 4294901760, %v132_v20  ;;  %v140_v28 = vand.u32 4294901760, %v139_v21  ;;  %v147_v29 = vand.u32 4294901760, %v146_v22  ;;  %v154_v36 = vand.u32 4294901760, %v153_v23  ;;  %s1692_s18 = scalar_lea.vmem %s1207_s17, 256  ;;  %p1697_p1 = scmp.lt.s32.totalorder %s1207_s17, %s1207_s17 }
   0x9   :  { %v105_v30 = vand.u32 4294901760, %v104_v24  ;;  %v127_v31 = vsub.f32 %v1771_v19, %v126_v25  ;;  %v115_v32 = vand.u32 4294901760, %v114_v26  ;;  %v1530_v49 = vpack.c.bf16 %v132_v20, %v1771_v19  ;;  %p1693_p0 = scmp.ne.s32.totalorder %s1207_s17, %s1692_s18  ;;  %p1698_p2 = scmp.lt.s32.totalorder %s1692_s18, %s1692_s18 }
   0xa   :  { %v134_v33 = vsub.f32 %v132_v20, %v133_v27  ;;  %v141_v34 = vsub.f32 %v139_v21, %v140_v28  ;;  %v148_v35 = vsub.f32 %v146_v22, %v147_v29  ;;  %v155_v47 = vsub.f32 %v153_v23, %v154_v36 }
   0xb   :  { %1521 = vmatpush3.bf16.msra.mxu0 %v1765_v16  ;;  %v106_v37 = vsub.f32 %v104_v24, %v105_v30  ;;  %v128_v38 = vand.u32 4294901760, %v127_v31  ;;  %v116_v39 = vsub.f32 %v114_v26, %v115_v32  ;;  %v1534_v50 = vpack.c.bf16 %v146_v22, %v139_v21  ;;  %p1699_p3 = por %p1698_p2, %p1697_p1 }
   0xc   :  { %1330 = vmatprep.subr.mxu0 %v1763_v13  ;;  %v135_v40 = vand.u32 4294901760, %v134_v33  ;;  %v142_v41 = vand.u32 4294901760, %v141_v34  ;;  %v149_v42 = vand.u32 4294901760, %v148_v35  ;;  %v156_v48 = vand.u32 4294901760, %v155_v47 }
   0xd   :  { %v107_v43 = vand.u32 4294901760, %v106_v37  ;;  %v117_v44 = vand.u32 4294901760, %v116_v39  ;;  %v1546_v51 = vpack.c.bf16 %v133_v27, %v126_v25  ;;  %v1550_v52 = vpack.c.bf16 %v147_v29, %v140_v28  ;;  %p1700_p4 = pnand %p1699_p3, %p1693_p0 }
   0xe   :  { %v1522_v45 = vpack.c.bf16 %v135_v40, %v128_v38  ;;  %v1526_v46 = vpack.c.bf16 %v149_v42, %v142_v41  ;;  %v622_v57 = vand.u32 4294901760, %v599_v54  ;;  %v625_v59 = vand.u32 4294901760, %v600_v55 }
   0xf   :  { %1331 = vmatpush3.msra.mxu0 %v1763_v13  ;;  %1332 = vmatprep.mubr.f32.mxu0 %v107_v43  ;;  %v628_v60 = vand.u32 4294901760, %v601_v58  ;;  %v1817_v62 = vsub.f32 %v598_v53, %v619_v56  ;;  %vm611_vm2 = vcmask 523264   ;;  %vm1198_vm3 = vcmask 261120  }
  0x10   :  { %1523 = vmatprep.subr.bf16.mxu0 %v1522_v45  ;;  %1333 = vmatmul.mubr.f32.vlgmr.msra.gmra.mrb[0].mxu0 %v117_v44  ;;  %v1815_v61 = vpack.c.bf16 %v622_v57, %v619_v56  ;;  %v1819_v63 = vsub.f32 %v599_v54, %v622_v57  ;;  %v1821_v0 = vsub.f32 %v600_v55, %v625_v59 }
  0x11   :  { %1525 = vmatpush3.bf16.msra.mxu0 %v1522_v45  ;;  %1345 = vmatprep.mubr.f32.mxu0 %v1767_v17  ;;  %v1823_v1 = vpack.c.bf16 %v628_v60, %v625_v59  ;;  %v1825_v2 = vsub.f32 %v601_v58, %v628_v60  ;;  %v714_v3 = vand.u32 4294901760, %v1817_v62 }
  0x12   :  { %1527 = vmatprep.subr.bf16.mxu0 %v1526_v46  ;;  %v721_v4 = vand.u32 4294901760, %v1819_v63  ;;  %v728_v5 = vand.u32 4294901760, %v1821_v0  ;;  %v1594_v44 = vpack.c.bf16 %v1819_v63, %v1817_v62 }
  0x13   :  { %v735_v6 = vand.u32 4294901760, %v1825_v2  ;;  %v715_v7 = vsub.f32 %v1817_v62, %v714_v3 }
  0x14   :  { %v722_v8 = vsub.f32 %v1819_v63, %v721_v4  ;;  %v729_v9 = vsub.f32 %v1821_v0, %v728_v5 }
  0x15   :  { %1529 = vmatpush3.bf16.msra.mxu0 %v1526_v46  ;;  %v736_v10 = vsub.f32 %v1825_v2, %v735_v6  ;;  %v716_v11 = vand.u32 4294901760, %v715_v7 }
  0x16   :  { %1343 = vmatprep.subr.mxu0 %v156_v48 }
  0x17   :  { %v737_v14 = vand.u32 4294901760, %v736_v10 }
  0x19   :  { %1344 = vmatpush3.msra.mxu0 %v156_v48 }
  0x1a   :  { %1531 = vmatprep.subr.bf16.mxu0 %v1530_v49  ;;  %1346 = vmatmul.mubr.f32.vlgmr.msra.gmra.mrb[0].mxu0 %v1769_v18 }
  0x1b   :  { %1533 = vmatpush3.bf16.msra.mxu0 %v1530_v49  ;;  %1358 = vmatprep.mubr.f32.mxu0 %v104_v24  ;;  %v605_v24 = vld [vmem:[%s1920_s2 + $0x38] sm:$0xff] }
  0x1c   :  { %1535 = vmatprep.subr.bf16.mxu0 %v1534_v50  ;;  %v640_v28 = vand.u32 4294901760, %v605_v24 }
  0x1f   :  { %1537 = vmatpush3.bf16.msra.mxu0 %v1534_v50 }
  0x20   :  { %1356 = vmatprep.subr.mxu0 %v153_v23 }
  0x23   :  { %1357 = vmatpush3.msra.mxu0 %v153_v23  ;;  %v604_v23 = vld [vmem:[%s1920_s2 + $0x30] sm:$0xff] }
  0x24   :  { %1539 = vmatprep.subr.bf16.mxu0 %v1761_v12  ;;  %1359 = vmatmul.mubr.f32.vlgmr.msra.gmra.mrb[0].mxu0 %v114_v26  ;;  %v637_v27 = vand.u32 4294901760, %v604_v23 }
  0x25   :  { %1541 = vmatpush3.bf16.msra.mxu0 %v1761_v12  ;;  %1371 = vmatprep.mubr.f32.mxu0 %v105_v30 }
  0x26   :  { %1543 = vmatprep.subr.bf16.mxu0 %v1765_v16  ;;  %v755_v31 = vsub.f32 %v604_v23, %v637_v27  ;;  %v1865_v46 = vpack.c.bf16 %v640_v28, %v637_v27 }
  0x28   :  { %v756_v35 = vand.u32 4294901760, %v755_v31 }
  0x29   :  { %1545 = vmatpush3.bf16.msra.mxu0 %v1765_v16 }
  0x2a   :  { %1369 = vmatprep.subr.mxu0 %v1763_v13  ;;  %v757_v38 = vsub.f32 %v755_v31, %v756_v35 }
  0x2c   :  { %v758_v40 = vand.u32 4294901760, %v757_v38 }
  0x2d   :  { %1370 = vmatpush3.msra.mxu0 %v1763_v13 }
  0x2e   :  { %1547 = vmatprep.subr.bf16.mxu0 %v1546_v51  ;;  %1372 = vmatmul.mubr.f32.vlgmr.msra.gmra.mrb[0].mxu0 %v115_v32  ;;  %v762_v32 = vsub.f32 %v605_v24, %v640_v28 }
  0x2f   :  { %1549 = vmatpush3.bf16.msra.mxu0 %v1546_v51  ;;  %1384 = vmatprep.mubr.f32.mxu0 %v1767_v17 }
  0x30   :  { %1551 = vmatprep.subr.bf16.mxu0 %v1550_v52  ;;  %v1606_v49 = vpack.c.bf16 %v762_v32, %v755_v31 }
  0x33   :  { %1553 = vmatpush3.bf16.msra.mxu0 %v1550_v52 }
  0x34   :  { %1382 = vmatprep.subr.mxu0 %v154_v36 }
  0x37   :  { %1383 = vmatpush3.msra.mxu0 %v154_v36  ;;  %v763_v36 = vand.u32 4294901760, %v762_v32 }
  0x38   :  { %1555 = vmatprep.subr.bf16.mxu0 %v1761_v12  ;;  %1385 = vmatmul.mubr.f32.vlgmr.msra.gmra.mrb[0].mxu0 %v1769_v18 }
  0x39   :  { %1557 = vmatpush3.bf16.msra.mxu0 %v1761_v12  ;;  %1397 = vmatprep.mubr.f32.mxu0 %v1767_v17  ;;  %v723_v12 = vand.u32 4294901760, %v722_v8  ;;  %v602_v17 = vld [vmem:[%s1920_s2 + $0x20] sm:$0xff]  ;;  %v764_v39 = vsub.f32 %v762_v32, %v763_v36  ;;  %v1871_v51 = vpack.c.bf16 %v763_v36, %v756_v35 }
  0x3a   :  { %1559 = vmatprep.subr.bf16.mxu0 %v1765_v16  ;;  %v631_v19 = vand.u32 4294901760, %v602_v17 }
  0x3b   :  { %v1578_v15 = vpack.c.bf16 %v723_v12, %v716_v11  ;;  %v765_v41 = vand.u32 4294901760, %v764_v39 }
  0x3c   :  { %v741_v21 = vsub.f32 %v602_v17, %v631_v19  ;;  %v1598_v17 = vpack.c.bf16 %v1825_v2, %v1821_v0 }
  0x3d   :  { %1561 = vmatpush3.bf16.msra.mxu0 %v1765_v16  ;;  %1579 = vmatprep.subr.bf16.mxu1 %v1578_v15  ;;  %v1590_v42 = vpack.c.bf16 %v765_v41, %v758_v40 }
  0x3e   :  { %1395 = vmatprep.subr.mxu0 %v1763_v13  ;;  %1581 = vmatpush3.bf16.msra.mxu1 %v1578_v15  ;;  %v742_v25 = vand.u32 4294901760, %v741_v21 }
  0x40   :  { %v743_v29 = vsub.f32 %v741_v21, %v742_v25 }
  0x41   :  { %1396 = vmatpush3.msra.mxu0 %v1763_v13  ;;  %v730_v13 = vand.u32 4294901760, %v729_v9 }
  0x42   :  { %1398 = vmatmul.mubr.f32.vlgmr.msra.gmra.mrb[0].mxu0 %v1769_v18  ;;  %1563 = vmatprep.subr.bf16.mxu0 %v1815_v61  ;;  %v603_v18 = vld [vmem:[%s1920_s2 + $0x28] sm:$0xff]  ;;  %v744_v33 = vand.u32 4294901760, %v743_v29 }
  0x43   :  { %1565 = vmatpush3.bf16.msra.mxu0 %v1815_v61  ;;  %v1582_v16 = vpack.c.bf16 %v737_v14, %v730_v13  ;;  %v634_v20 = vand.u32 4294901760, %v603_v18 }
  0x44   :  { %1567 = vmatprep.subr.bf16.mxu0 %v1823_v1 }
  0x45   :  { %1583 = vmatprep.subr.bf16.mxu1 %v1582_v16  ;;  %v748_v22 = vsub.f32 %v603_v18, %v634_v20  ;;  %v1859_v43 = vpack.c.bf16 %v634_v20, %v631_v19 }
  0x46   :  { %1585 = vmatpush3.bf16.msra.mxu1 %v1582_v16 }
  0x47   :  { %1569 = vmatpush3.bf16.msra.mxu0 %v1823_v1  ;;  %v749_v26 = vand.u32 4294901760, %v748_v22  ;;  %v1602_v48 = vpack.c.bf16 %v748_v22, %v741_v21 }
  0x48   :  { %1571 = vmatprep.subr.bf16.mxu0 %v1859_v43 }
  0x49   :  { %v750_v30 = vsub.f32 %v748_v22, %v749_v26  ;;  %v1869_v50 = vpack.c.bf16 %v749_v26, %v742_v25  ;;  %v1626_v25 = vpack.c.bf16 %v721_v4, %v714_v3  ;;  %v1630_v26 = vpack.c.bf16 %v735_v6, %v728_v5 }
  0x4b   :  { %v751_v34 = vand.u32 4294901760, %v750_v30  ;;  %1573 = vmatpush3.bf16.msra.mxu0 %v1859_v43 }
  0x4c   :  { %1575 = vmatprep.subr.bf16.mxu0 %v1865_v46 }
  0x4d   :  { %v1586_v37 = vpack.c.bf16 %v751_v34, %v744_v33 }
  0x4f   :  { %1587 = vmatprep.subr.bf16.mxu1 %v1586_v37  ;;  %1577 = vmatpush3.bf16.msra.mxu0 %v1865_v46 }
  0x50   :  { %1589 = vmatpush3.bf16.msra.mxu1 %v1586_v37 }
  0x51   :  { %1591 = vmatprep.subr.bf16.mxu1 %v1590_v42 }
  0x54   :  { %1593 = vmatpush3.bf16.msra.mxu1 %v1590_v42 }
  0x55   :  { %1595 = vmatprep.subr.bf16.mxu1 %v1594_v44 }
 0x115   :  { %v1399_v45 = vpop.f32.mrb[0].mxu0 }
 0x116   :  { %v564_v47 = vpop.f32.mrb[1].mxu0  ;;  %v1218_v53 = vmul.f32 -1.442695, %v1399_v45 }
 0x117   :  { %590 = vrot.lane.b32.xlu0 %v564_v47, %s1716_s13  ;;  %v1217_v52 = vmul.f32 -1.442695, %v564_v47 }
 0x119   :  { %1684 = vpow2.f32 %v1217_v52 }
 0x11a   :  { %1686 = vpow2.f32 %v1218_v53 }
 0x11b   :  { %592 = vrot.lane.b32.xlu0 %v1399_v45, %s1716_s13 }
 0x123   :  { %v1685_v54 = vpop.eup %1684 }
 0x124   :  { %v580_v55 = vadd.f32 1.0, %v1685_v54  ;;  %v1687_v56 = vpop.eup %1686 }
 0x125   :  { %v581_v57 = vadd.f32 1.0, %v1687_v56 }
 0x126   :  { %1688 = vrcp.f32 %v580_v55 }
 0x127   :  { %1690 = vrcp.f32 %v581_v57 }
 0x130   :  { %v1689_v58 = vpop.eup %1688 }
 0x131   :  { %v586_v59 = vmul.f32 %v1689_v58, %v564_v47  ;;  %v1691_v60 = vpop.eup %1690 }
 0x132   :  { %v587_v10 = vmul.f32 %v1691_v60, %v1399_v45 }
 0x189   :  { %v591_v7 = vpop.permute.xlu0 %590 }
 0x18a   :  { %v596_v8 = vmul.f32 %v591_v7, %v586_v59 }
 0x18c   :  { %v613_v9 = vsel %vm611_vm2, %v596_v8, 0 }
 0x18d   :  { %v691_v11 = vand.u32 4294901760, %v613_v9  ;;  %v593_v12 = vpop.permute.xlu0 %592 }
 0x18e   :  { %v597_v13 = vmul.f32 %v593_v12, %v587_v10 }
 0x18f   :  { %v692_v14 = vsub.f32 %v613_v9, %v691_v11  ;;  %1435 = vmatprep.mubr.f32.mxu1 %v691_v11 }
 0x190   :  { %v616_v15 = vsel %vm611_vm2, %v597_v13, 0 }
 0x191   :  { %v701_v16 = vand.u32 4294901760, %v616_v15  ;;  %v693_v18 = vand.u32 4294901760, %v692_v14 }
 0x193   :  { %v702_v19 = vsub.f32 %v616_v15, %v701_v16  ;;  %1436 = vmatmul.mubr.f32.vlgmr.msra.gmra.mrb[0].mxu1 %v701_v16  ;;  %v694_v20 = vsub.f32 %v692_v14, %v693_v18 }
 0x194   :  { %1597 = vmatpush3.bf16.msra.mxu1 %v1594_v44  ;;  %1454 = vmatprep.mubr.f32.mxu1 %v692_v14 }
 0x195   :  { %v703_v21 = vand.u32 4294901760, %v702_v19  ;;  %1599 = vmatprep.subr.bf16.mxu1 %v1598_v17  ;;  %v695_v22 = vand.u32 4294901760, %v694_v20 }
 0x197   :  { %1416 = vmatprep.mubr.f32.mxu0 %v695_v22  ;;  %v704_v23 = vsub.f32 %v702_v19, %v703_v21 }
 0x198   :  { %1601 = vmatpush3.bf16.msra.mxu1 %v1598_v17 }
 0x199   :  { %1603 = vmatprep.subr.bf16.mxu1 %v1602_v48  ;;  %v705_v24 = vand.u32 4294901760, %v704_v23 }
 0x19b   :  { %1417 = vmatmul.mubr.f32.vlgmr.msra.gmra.mrb[2].mxu0 %v705_v24 }
 0x19c   :  { %1605 = vmatpush3.bf16.msra.mxu1 %v1602_v48 }
 0x19d   :  { %1607 = vmatprep.subr.bf16.mxu1 %v1606_v49 }
 0x1a0   :  { %1609 = vmatpush3.bf16.msra.mxu1 %v1606_v49 }
 0x1a1   :  { %1611 = vmatprep.subr.bf16.mxu1 %v1815_v61 }
 0x1a3   :  { %1455 = vmatmul.mubr.f32.vlgmr.msra.gmra.mrb[0].mxu1 %v702_v19 }
 0x1a4   :  { %1613 = vmatpush3.bf16.msra.mxu1 %v1815_v61  ;;  %1473 = vmatprep.mubr.f32.mxu1 %v693_v18 }
 0x1a5   :  { %1615 = vmatprep.subr.bf16.mxu1 %v1823_v1 }
 0x1a8   :  { %1617 = vmatpush3.bf16.msra.mxu1 %v1823_v1 }
 0x1a9   :  { %1619 = vmatprep.subr.bf16.mxu1 %v1859_v43 }
 0x1ac   :  { %1621 = vmatpush3.bf16.msra.mxu1 %v1859_v43 }
 0x1ad   :  { %1623 = vmatprep.subr.bf16.mxu1 %v1865_v46 }
 0x1b0   :  { %1625 = vmatpush3.bf16.msra.mxu1 %v1865_v46 }
 0x1b1   :  { %1627 = vmatprep.subr.bf16.mxu1 %v1626_v25 }
 0x1b3   :  { %1474 = vmatmul.mubr.f32.vlgmr.msra.gmra.mrb[0].mxu1 %v703_v21 }
 0x1b4   :  { %1629 = vmatpush3.bf16.msra.mxu1 %v1626_v25  ;;  %1492 = vmatprep.mubr.f32.mxu1 %v691_v11 }
 0x1b5   :  { %1631 = vmatprep.subr.bf16.mxu1 %v1630_v26 }
 0x1b8   :  { %1633 = vmatpush3.bf16.msra.mxu1 %v1630_v26 }
 0x1b9   :  { %1635 = vmatprep.subr.bf16.mxu1 %v1869_v50 }
 0x1bc   :  { %1637 = vmatpush3.bf16.msra.mxu1 %v1869_v50 }
 0x1bd   :  { %1639 = vmatprep.subr.bf16.mxu1 %v1871_v51 }
 0x1c0   :  { %1641 = vmatpush3.bf16.msra.mxu1 %v1871_v51 }
 0x1c1   :  { %1643 = vmatprep.subr.bf16.mxu1 %v1815_v61 }
 0x1c3   :  { %1493 = vmatmul.mubr.f32.vlgmr.msra.gmra.mrb[0].mxu1 %v701_v16 }
 0x1c4   :  { %1645 = vmatpush3.bf16.msra.mxu1 %v1815_v61  ;;  %1511 = vmatprep.mubr.f32.mxu1 %v691_v11  ;;  %v1219_v61 = vld [vmem:[%s1920_s2 + $0x40] ss:$0 sm:$0xff] }
 0x1c5   :  { %1647 = vmatprep.subr.bf16.mxu1 %v1823_v1 }
 0x1c8   :  { %1649 = vmatpush3.bf16.msra.mxu1 %v1823_v1 }
 0x1c9   :  { %1651 = vmatprep.subr.bf16.mxu1 %v1859_v43 }
 0x1cc   :  { %1653 = vmatpush3.bf16.msra.mxu1 %v1859_v43 }
 0x1cd   :  { %1655 = vmatprep.subr.bf16.mxu1 %v1865_v46 }
 0x1d0   :  { %1657 = vmatpush3.bf16.msra.mxu1 %v1865_v46 }
 0x1d3   :  { %1512 = vmatmul.mubr.f32.vlgmr.msra.gmra.mrb[0].mxu1 %v701_v16 }
 0x26e   :  { %v1418_v62 = vpop.f32.mrb[2].mxu0 }
 0x26f   :  { %v697_v63 = vpop.f32.mrb[3].mxu0  ;;  %v708_v0 = vadd.f32 %v1418_v62, %v1219_v61 }
 0x270   :  { %v698_v2 = vadd.f32 %v1219_v61, %v697_v63 }
 0x2a6   :  { %v1513_v1 = vpop.f32.mrb[0].mxu1 }
 0x2a7   :  { %v1659_v3 = vadd.f32 %v1513_v1, %v708_v0  ;;  %v1188_v4 = vpop.f32.mrb[1].mxu1 }
 0x2a8   :  { %v1661_v5 = vadd.f32 %v1188_v4, %v698_v2 }
 0x2a9   :  { %1200 = vst.msk [vmem:[#allocation2 + $0x8] sm:$0xff] %vm1198_vm3, %v1659_v3 }
 0x2aa   :  { %1199 = vst.msk [vmem:[#allocation2] sm:$0xff] %vm1198_vm3, %v1661_v5 }
 0x2ab   :  { %1703 = shalt.err (!%p1700_p4)
}
 0x2ac   :  { %s1704_s20 = scalar_lea.hbm %s1921_s3, 256 }
 0x2ad   :  { %p1705_p5 = scmp.ne.s32.totalorder %s1921_s3, %s1704_s20  ;;  %p1708_p6 = scmp.lt.u32.totalorder %s1704_s20, %s1921_s3 }
 0x2af   :  { %p1710_p7 = pnand %p1708_p6, %p1705_p5 }
 0x2b1   :  { %1713 = shalt.err (!%p1710_p7)
}
 0x2b2   :  { %s1718_s25 = smov 128   ;;  %s1719_s0 = smov 8  }
 0x2b3   :  { %1212 = dma.vmem_to_hbm [thread:$0]  %s1207_s17, 256, %s1921_s3, [#allocation3], %s1718_s25, %s1718_s25, %s1719_s0  }
 0x2b4   :  { %1714 = dma.done.wait [#allocation3], 256  }
 0x2b5   :  { %1715 = vsyncadd [#allocation3], 4294967040 }
 0x2b6   :  { %1216 = vsyncpa [#allocation3], 1 }

</bundles_post_ra>
